<compile_context>
chip_gen: v7x
topology: tpu7x:2x2x1
jax: 0.10.0
libtpu: 0.0.40
codegen_flags: <defaults>
</compile_context>

<pallas_src>
import math
import functools

import jax
import jax.numpy as jnp
from jax.experimental import pallas as pl
from jax.experimental.pallas import tpu as pltpu


def _round_up(x, m):
    return ((x + m - 1) // m) * m


def _ac_kernel(x_ref, w1_ref, b1_ref, w2_ref, b2_ref, wh_ref, bh_ref, out_ref):
    # x / weights are bf16, accumulation is f32 on the MXU, biases are f32.
    h1 = jnp.dot(x_ref[...], w1_ref[...],
                 preferred_element_type=jnp.float32) + b1_ref[...]
    h1 = jnp.maximum(h1, 0.0).astype(jnp.bfloat16)

    h2 = jnp.dot(h1, w2_ref[...],
                 preferred_element_type=jnp.float32) + b2_ref[...]
    h2 = jnp.maximum(h2, 0.0).astype(jnp.bfloat16)

    # Fused actor|critic|zero-pad head: single lane-dense 128-wide output.
    out_ref[...] = jnp.dot(h2, wh_ref[...],
                           preferred_element_type=jnp.float32) + bh_ref[...]


def prepare_params(raw_params):
    """Pad / fuse / downcast the raw (PyTorch-layout) f32 params for the kernel.

    Raw weights are (in_features, out_features); biases are (1, out_features).
    Returns ((w1p, b1, w2, b2, wh, bh), meta) with bf16 weights, f32 biases.
    """
    w1, b1, w2, b2, wa, ba, wc, bc = raw_params
    state_size, fc1 = w1.shape
    fc2, action_size = wa.shape

    k1 = _round_up(state_size, 128)            # padded contraction dim, layer 1
    nh = _round_up(action_size + 1, 128)       # padded fused-head width

    w1p = jnp.zeros((k1, fc1), jnp.float32).at[:state_size, :].set(w1)

    wh = jnp.zeros((fc2, nh), jnp.float32)
    wh = wh.at[:, :action_size].set(wa).at[:, action_size:action_size + 1].set(wc)
    bh = jnp.zeros((1, nh), jnp.float32)
    bh = bh.at[:, :action_size].set(ba).at[:, action_size:action_size + 1].set(bc)

    prepped = (
        w1p.astype(jnp.bfloat16),
        b1.astype(jnp.float32),
        w2.astype(jnp.bfloat16),
        b2.astype(jnp.float32),
        wh.astype(jnp.bfloat16),
        bh.astype(jnp.float32),
    )
    meta = dict(state_size=state_size, action_size=action_size, k1=k1, nh=nh)
    return prepped, meta


@functools.partial(jax.jit, static_argnames=("state_size", "action_size"))
def actor_critic_forward(x, prepped, *, state_size, action_size):
    """Run the fused ActorCritic forward pass as one Pallas kernel."""
    w1p, b1, w2b, b2, wh, bh = prepped
    B = x.shape[0]
    k1 = w1p.shape[0]
    nh = wh.shape[1]

    # Batch tiling: TB rows per grid step, weights stay resident across steps.
    b_pad = _round_up(max(B, 8), 8)
    TB = min(256, b_pad)
    b_pad = _round_up(b_pad, TB)
    grid = (b_pad // TB,)

    # Pad features to the 128-lane-aligned contraction dim, pad batch, cast to
    # bf16 once at the boundary (kernel body stays cast-free for the input).
    xp = jnp.zeros((b_pad, k1), jnp.bfloat16)
    xp = xp.at[:B, :state_size].set(x.astype(jnp.bfloat16))

    out = pl.pallas_call(
        _ac_kernel,
        out_shape=jax.ShapeDtypeStruct((b_pad, nh), jnp.float32),
        grid=grid,
        in_specs=[
            pl.BlockSpec((TB, k1), lambda i: (i, 0)),        # x tile (pipelined)
            pl.BlockSpec(w1p.shape, lambda i: (0, 0)),       # weights: grid-invariant
            pl.BlockSpec(b1.shape, lambda i: (0, 0)),
            pl.BlockSpec(w2b.shape, lambda i: (0, 0)),
            pl.BlockSpec(b2.shape, lambda i: (0, 0)),
            pl.BlockSpec(wh.shape, lambda i: (0, 0)),
            pl.BlockSpec(bh.shape, lambda i: (0, 0)),
        ],
        out_specs=pl.BlockSpec((TB, nh), lambda i: (i, 0)),  # lane-dense 128-wide out
        compiler_params=pltpu.CompilerParams(
            dimension_semantics=("parallel",)),              # shards batch over TCs on v7x
    )(xp, w1p, b1, w2b, b2, wh, bh)

    probs = out[:B, :action_size]
    value = out[:B, action_size:action_size + 1]
    return probs, value


def init_params(key, state_size, action_size, fc1_size=128, fc2_size=256):
    """Deterministic init mimicking nn.Linear's U(-1/sqrt(fan_in), 1/sqrt(fan_in))."""
    keys = jax.random.split(key, 8)

    def linear(kw, kb, fan_in, fan_out):
        bound = 1.0 / math.sqrt(fan_in)
        w = jax.random.uniform(kw, (fan_in, fan_out), jnp.float32, -bound, bound)
        b = jax.random.uniform(kb, (1, fan_out), jnp.float32, -bound, bound)
        return w, b

    w1, b1 = linear(keys[0], keys[1], state_size, fc1_size)
    w2, b2 = linear(keys[2], keys[3], fc1_size, fc2_size)
    wa, ba = linear(keys[4], keys[5], fc2_size, action_size)
    wc, bc = linear(keys[6], keys[7], fc2_size, 1)
    return (w1, b1, w2, b2, wa, ba, wc, bc)


if __name__ == "__main__":
    # Small shapes consistent with the module's forward.
    B, STATE, ACTION = 8, 16, 8
    FC1, FC2 = 128, 256

    key = jax.random.PRNGKey(0)
    k_x, k_p = jax.random.split(key)

    x = jax.random.normal(k_x, (B, STATE), jnp.float32)
    raw_params = init_params(k_p, STATE, ACTION, FC1, FC2)
    prepped, meta = prepare_params(raw_params)

    probs, value = actor_critic_forward(
        x, prepped, state_size=STATE, action_size=ACTION)
    jax.block_until_ready((probs, value))

    assert probs.shape == (B, ACTION) and value.shape == (B, 1)

    # --- Reference 1: same bf16-input / f32-accumulate numerics (tight check) ---
    w1p, b1, w2b, b2, wh, bh = prepped
    xb = x.astype(jnp.bfloat16).astype(jnp.float32)
    h1 = jnp.maximum(xb @ w1p[:STATE].astype(jnp.float32) + b1, 0.0)
    h1b = h1.astype(jnp.bfloat16).astype(jnp.float32)
    h2 = jnp.maximum(h1b @ w2b.astype(jnp.float32) + b2, 0.0)
    h2b = h2.astype(jnp.bfloat16).astype(jnp.float32)
    head = h2b @ wh.astype(jnp.float32) + bh
    ref_probs_bf16 = head[:, :ACTION]
    ref_value_bf16 = head[:, ACTION:ACTION + 1]
    assert jnp.allclose(probs, ref_probs_bf16, atol=1e-4, rtol=1e-4)
    assert jnp.allclose(value, ref_value_bf16, atol=1e-4, rtol=1e-4)

    # --- Reference 2: pure f32 PyTorch-equivalent math (loose, bf16 weights) ---
    w1, b1f, w2, b2f, wa, ba, wc, bc = raw_params
    h1f = jnp.maximum(x @ w1 + b1f, 0.0)
    h2f = jnp.maximum(h1f @ w2 + b2f, 0.0)
    assert jnp.allclose(probs, h2f @ wa + ba, atol=5e-2, rtol=5e-2)
    assert jnp.allclose(value, h2f @ wc + bc, atol=5e-2, rtol=5e-2)

    print("KERNEL_OK")
</pallas_src>

<mosaic_0001>
module attributes {stable_mosaic.version = 11 : i64} {
  func.func @_ac_kernel(%arg0: i32, %arg1: memref<8x128xbf16, #tpu.memory_space<vmem>>, %arg2: memref<128x128xbf16, #tpu.memory_space<vmem>>, %arg3: memref<1x128xf32, #tpu.memory_space<vmem>>, %arg4: memref<128x256xbf16, #tpu.memory_space<vmem>>, %arg5: memref<1x256xf32, #tpu.memory_space<vmem>>, %arg6: memref<256x128xbf16, #tpu.memory_space<vmem>>, %arg7: memref<1x128xf32, #tpu.memory_space<vmem>>, %arg8: memref<8x128xf32, #tpu.memory_space<vmem>>) attributes {dimension_semantics = [#tpu.dimension_semantics<parallel>], iteration_bounds = array<i64: 1>, scalar_prefetch = 0 : i64, scratch_operands = 0 : i64, tpu.core_type = #tpu.core_type<tc>, window_params = [{transform_indices = @transform_0, window_bounds = array<i64: 8, 128>}, {pipeline_mode = #tpu.pipeline_mode<synchronous>, transform_indices = @transform_1, window_bounds = array<i64: 128, 128>}, {pipeline_mode = #tpu.pipeline_mode<synchronous>, transform_indices = @transform_2, window_bounds = array<i64: 1, 128>}, {pipeline_mode = #tpu.pipeline_mode<synchronous>, transform_indices = @transform_3, window_bounds = array<i64: 128, 256>}, {pipeline_mode = #tpu.pipeline_mode<synchronous>, transform_indices = @transform_4, window_bounds = array<i64: 1, 256>}, {pipeline_mode = #tpu.pipeline_mode<synchronous>, transform_indices = @transform_5, window_bounds = array<i64: 256, 128>}, {pipeline_mode = #tpu.pipeline_mode<synchronous>, transform_indices = @transform_6, window_bounds = array<i64: 1, 128>}, {transform_indices = @transform_7, window_bounds = array<i64: 8, 128>}]} {
    %c0 = arith.constant 0 : index
    %c0_0 = arith.constant 0 : index
    %0 = vector.load %arg1[%c0, %c0_0] : memref<8x128xbf16, #tpu.memory_space<vmem>>, vector<8x128xbf16>
    %c0_1 = arith.constant 0 : index
    %c0_2 = arith.constant 0 : index
    %1 = vector.load %arg2[%c0_1, %c0_2] : memref<128x128xbf16, #tpu.memory_space<vmem>>, vector<128x128xbf16>
    %cst = arith.constant dense<0.000000e+00> : vector<8x128xf32>
    %2 = tpu.matmul %0, %1, %cst {dimension_numbers = #tpu.dot_dimension_numbers<[1], [0], [0], [1], [0, 0, 1, 1], [], []>} : vector<8x128xbf16>, vector<128x128xbf16>, vector<8x128xf32> -> vector<8x128xf32>
    %c0_3 = arith.constant 0 : index
    %c0_4 = arith.constant 0 : index
    %3 = vector.load %arg3[%c0_3, %c0_4] : memref<1x128xf32, #tpu.memory_space<vmem>>, vector<1x128xf32>
    %4 = vector.broadcast %3 : vector<1x128xf32> to vector<8x128xf32>
    %5 = arith.addf %2, %4 : vector<8x128xf32>
    %cst_5 = arith.constant 0.000000e+00 : f32
    %6 = vector.broadcast %cst_5 : f32 to vector<8x128xf32>
    %7 = arith.maximumf %5, %6 : vector<8x128xf32>
    %8 = arith.truncf %7 : vector<8x128xf32> to vector<8x128xbf16>
    %c0_6 = arith.constant 0 : index
    %c0_7 = arith.constant 0 : index
    %9 = vector.load %arg4[%c0_6, %c0_7] : memref<128x256xbf16, #tpu.memory_space<vmem>>, vector<128x256xbf16>
    %cst_8 = arith.constant dense<0.000000e+00> : vector<8x256xf32>
    %10 = tpu.matmul %8, %9, %cst_8 {dimension_numbers = #tpu.dot_dimension_numbers<[1], [0], [0], [1], [0, 0, 1, 1], [], []>} : vector<8x128xbf16>, vector<128x256xbf16>, vector<8x256xf32> -> vector<8x256xf32>
    %c0_9 = arith.constant 0 : index
    %c0_10 = arith.constant 0 : index
    %11 = vector.load %arg5[%c0_9, %c0_10] : memref<1x256xf32, #tpu.memory_space<vmem>>, vector<1x256xf32>
    %12 = vector.broadcast %11 : vector<1x256xf32> to vector<8x256xf32>
    %13 = arith.addf %10, %12 : vector<8x256xf32>
    %cst_11 = arith.constant 0.000000e+00 : f32
    %14 = vector.broadcast %cst_11 : f32 to vector<8x256xf32>
    %15 = arith.maximumf %13, %14 : vector<8x256xf32>
    %16 = arith.truncf %15 : vector<8x256xf32> to vector<8x256xbf16>
    %c0_12 = arith.constant 0 : index
    %c0_13 = arith.constant 0 : index
    %17 = vector.load %arg6[%c0_12, %c0_13] : memref<256x128xbf16, #tpu.memory_space<vmem>>, vector<256x128xbf16>
    %cst_14 = arith.constant dense<0.000000e+00> : vector<8x128xf32>
    %18 = tpu.matmul %16, %17, %cst_14 {dimension_numbers = #tpu.dot_dimension_numbers<[1], [0], [0], [1], [0, 0, 1, 1], [], []>} : vector<8x256xbf16>, vector<256x128xbf16>, vector<8x128xf32> -> vector<8x128xf32>
    %c0_15 = arith.constant 0 : index
    %c0_16 = arith.constant 0 : index
    %19 = vector.load %arg7[%c0_15, %c0_16] : memref<1x128xf32, #tpu.memory_space<vmem>>, vector<1x128xf32>
    %20 = vector.broadcast %19 : vector<1x128xf32> to vector<8x128xf32>
    %21 = arith.addf %18, %20 : vector<8x128xf32>
    %c0_17 = arith.constant 0 : index
    %c0_18 = arith.constant 0 : index
    %22 = vector.load %arg8[%c0_17, %c0_18] : memref<8x128xf32, #tpu.memory_space<vmem>>, vector<8x128xf32>
    tpu.vector_store %arg8[%c0_17, %c0_18], %21 {strides = array<i32>} : memref<8x128xf32, #tpu.memory_space<vmem>>, vector<8x128xf32>,
    return
  }
  func.func @transform_0(%arg0: i32) -> (i32, i32) {
    %c0_i32 = arith.constant 0 : i32
    %c0_i32_0 = arith.constant 0 : i32
    return %arg0, %c0_i32 : i32, i32
  }
  func.func @transform_1(%arg0: i32) -> (i32, i32) {
    %c0_i32 = arith.constant 0 : i32
    %c0_i32_0 = arith.constant 0 : i32
    %c0_i32_1 = arith.constant 0 : i32
    return %c0_i32, %c0_i32_0 : i32, i32
  }
  func.func @transform_2(%arg0: i32) -> (i32, i32) {
    %c0_i32 = arith.constant 0 : i32
    %c0_i32_0 = arith.constant 0 : i32
    %c0_i32_1 = arith.constant 0 : i32
    return %c0_i32, %c0_i32_0 : i32, i32
  }
  func.func @transform_3(%arg0: i32) -> (i32, i32) {
    %c0_i32 = arith.constant 0 : i32
    %c0_i32_0 = arith.constant 0 : i32
    %c0_i32_1 = arith.constant 0 : i32
    return %c0_i32, %c0_i32_0 : i32, i32
  }
  func.func @transform_4(%arg0: i32) -> (i32, i32) {
    %c0_i32 = arith.constant 0 : i32
    %c0_i32_0 = arith.constant 0 : i32
    %c0_i32_1 = arith.constant 0 : i32
    return %c0_i32, %c0_i32_0 : i32, i32
  }
  func.func @transform_5(%arg0: i32) -> (i32, i32) {
    %c0_i32 = arith.constant 0 : i32
    %c0_i32_0 = arith.constant 0 : i32
    %c0_i32_1 = arith.constant 0 : i32
    return %c0_i32, %c0_i32_0 : i32, i32
  }
  func.func @transform_6(%arg0: i32) -> (i32, i32) {
    %c0_i32 = arith.constant 0 : i32
    %c0_i32_0 = arith.constant 0 : i32
    %c0_i32_1 = arith.constant 0 : i32
    return %c0_i32, %c0_i32_0 : i32, i32
  }
  func.func @transform_7(%arg0: i32) -> (i32, i32) {
    %c0_i32 = arith.constant 0 : i32
    %c0_i32_0 = arith.constant 0 : i32
    return %arg0, %c0_i32 : i32, i32
  }
}

</mosaic_0001>

<bundles_post_ra>
// kernel: actor_critic_forward.1
= control target key start
LH: loop header
LB: loop body
LE: loop exit
PB: predicated region body
PF: predicated region fallthrough
CT: control target
= control target key end

     0   :  { %12 = vsyncpa [#allocation3], 0  ;;  %s839_s0 = inlined_call_operand.vmem [shape: bf16[8,128], index: 0, kind: input, shape index: {}]   ;;  %s840_s1 = inlined_call_operand.hbm [shape: bf16[128,128], index: 1, kind: input, shape index: {}]   ;;  %s841_s2 = inlined_call_operand.vmem [shape: f32[1,128], index: 2, kind: input, shape index: {}]   ;;  %s842_s3 = inlined_call_operand.hbm [shape: bf16[128,256], index: 3, kind: input, shape index: {}]   ;;  %s843_s4 = inlined_call_operand.vmem [shape: f32[1,256], index: 4, kind: input, shape index: {}]   ;;  %s844_s5 = inlined_call_operand.hbm [shape: bf16[256,128], index: 5, kind: input, shape index: {}]   ;;  %s845_s6 = inlined_call_operand.vmem [shape: f32[1,128], index: 6, kind: input, shape index: {}]   ;;  %s846_s7 = inlined_call_operand.vmem [shape: f32[8,128], index: 7, kind: output, shape index: {}]  }
   0x1   :  { %13 = vsyncpa [#allocation5], 0  ;;  %s738_s24 = smov [#allocation4]   ;;  %s668_s28 = scalar_lea.hbm %s842_s3, 2048 }
   0x2   :  { %s35_s25 = sshll.u32 %s738_s24, 4  ;;  %p669_p0 = scmp.ne.s32.totalorder %s842_s3, %s668_s28  ;;  %s36_s25 = int_to_ptr.vmem [resolvable:$true] %s35_s25 }
   0x3   :  { %p672_p1 = scmp.lt.u32.totalorder %s668_s28, %s842_s3 }
   0x5   :  { %p674_p2 = pnand %p672_p1, %p669_p0 }
   0x7   :  { %677 = shalt.err (!%p674_p2)
}
   0x8   :  { %s678_s10 = scalar_lea.vmem %s36_s25, 2048  ;;  %p683_p4 = scmp.lt.s32.totalorder %s36_s25, %s36_s25 }
   0x9   :  { %p679_p3 = scmp.ne.s32.totalorder %s36_s25, %s678_s10  ;;  %p684_p5 = scmp.lt.s32.totalorder %s678_s10, %s678_s10 }
   0xb   :  { %p685_p6 = por %p684_p5, %p683_p4 }
   0xd   :  { %p686_p7 = pnand %p685_p6, %p679_p3 }
   0xf   :  { %689 = shalt.err (!%p686_p7)
}
  0x10   :  { %s739_s11 = smov 128   ;;  %s740_s12 = smov 8  }
  0x11   :  { %41 = dma.hbm_to_vmem [thread:$0]  %s842_s3, 2048, %s36_s25, [#allocation5], %s739_s11, %s739_s11, %s740_s12  }
  0x12   :  { %s741_s15 = smov [#allocation2]   ;;  %s690_s19 = scalar_lea.hbm %s840_s1, 1024 }
  0x13   :  { %s21_s16 = sshll.u32 %s741_s15, 4  ;;  %p691_p8 = scmp.ne.s32.totalorder %s840_s1, %s690_s19  ;;  %s22_s16 = int_to_ptr.vmem [resolvable:$true] %s21_s16 }
  0x14   :  { %p694_p9 = scmp.lt.u32.totalorder %s690_s19, %s840_s1 }
  0x16   :  { %p696_p10 = pnand %p694_p9, %p691_p8 }
  0x18   :  { %699 = shalt.err (!%p696_p10)
}
  0x19   :  { %s700_s24 = scalar_lea.vmem %s22_s16, 1024  ;;  %p705_p12 = scmp.lt.s32.totalorder %s22_s16, %s22_s16 }
  0x1a   :  { %p701_p11 = scmp.ne.s32.totalorder %s22_s16, %s700_s24  ;;  %p706_p13 = scmp.lt.s32.totalorder %s700_s24, %s700_s24 }
  0x1c   :  { %p707_p0 = por %p706_p13, %p705_p12 }
  0x1e   :  { %p708_p1 = pnand %p707_p0, %p701_p11 }
  0x20   :  { %711 = shalt.err (!%p708_p1)
}
  0x21   :  { %s742_s3 = smov 64   ;;  %s743_s25 = smov 4  }
  0x22   :  { %27 = dma.hbm_to_vmem [thread:$0]  %s840_s1, 1024, %s22_s16, [#allocation3], %s742_s3, %s742_s3, %s743_s25  }
  0x23   :  { %s744_s28 = smov [#allocation6]   ;;  %s712_s9 = scalar_lea.hbm %s844_s5, 2048 }
  0x24   :  { %s49_s29 = sshll.u32 %s744_s28, 4  ;;  %p713_p2 = scmp.ne.s32.totalorder %s844_s5, %s712_s9  ;;  %s50_s29 = int_to_ptr.vmem [resolvable:$true] %s49_s29 }
  0x25   :  { %p716_p3 = scmp.lt.u32.totalorder %s712_s9, %s844_s5 }
  0x27   :  { %p718_p4 = pnand %p716_p3, %p713_p2 }
  0x29   :  { %721 = shalt.err (!%p718_p4)
}
  0x2a   :  { %s722_s14 = scalar_lea.vmem %s50_s29, 2048  ;;  %p727_p6 = scmp.lt.s32.totalorder %s50_s29, %s50_s29 }
  0x2b   :  { %p723_p5 = scmp.ne.s32.totalorder %s50_s29, %s722_s14  ;;  %p728_p7 = scmp.lt.s32.totalorder %s722_s14, %s722_s14 }
  0x2d   :  { %p729_p8 = por %p728_p7, %p727_p6 }
  0x2f   :  { %p730_p9 = pnand %p729_p8, %p723_p5 }
  0x31   :  { %733 = shalt.err (!%p730_p9)
}
  0x32   :  { %55 = dma.hbm_to_vmem [thread:$0]  %s844_s5, 2048, %s50_s29, [#allocation5], %s742_s3, %s742_s3, %s743_s25  }
  0x33   :  { %734 = dma.done.wait [#allocation3], 1024  }
  0x34   :  { %735 = vsyncadd [#allocation3], 4294966272 }
  0x35   :  { %736 = dma.done.wait [#allocation5], 4096  }
  0x36   :  { %737 = vsyncadd [#allocation5], 4294963200  ;;  %v745_v0 = vmov 0.0   ;;  %vm746_vm0 = vmmov 0   ;;  %v620_v1 = vld [vmem:[#allocation2] sm:$0xff]   ;;  %v621_v2 = vld [vmem:[#allocation2 + $0x8] sm:$0xff]   ;;  %v200_v51 = vlaneseq }
  0x37   :  { %590 = vmatprep.subr.bf16.mxu0 %v745_v0  ;;  %606 = vmatprep.mubr.msk.bf16.mxu0 %vm746_vm0, %v745_v0  ;;  %v622_v3 = vld [vmem:[#allocation2 + $0x10] sm:$0xff]   ;;  %v628_v4 = vld [vmem:[#allocation4 + $0x4] ss:$8 sps:$4 sm:$0xff]   ;;  %v630_v5 = vld [vmem:[#allocation4] ss:$8 sps:$4 sm:$0xff]   ;;  %v747_v26 = vmov 0  }
  0x38   :  { %591 = vmatpush3.bf16.msra.mxu0 %v620_v1  ;;  %v623_v6 = vld [vmem:[#allocation2 + $0x18] sm:$0xff]   ;;  %290 = vmatprep.subr.bf16.mxu1 %v628_v4  ;;  %v634_v9 = vld [vmem:[#allocation4 + $0x24] ss:$8 sps:$4 sm:$0xff]   ;;  %v636_v11 = vld [vmem:[#allocation4 + $0x20] ss:$8 sps:$4 sm:$0xff]   ;;  %v201_v52 = vshrl.u32 %v200_v51, 7 }
  0x39   :  { %592 = vmatprep.subr.bf16.mxu0 %v745_v0  ;;  %v631_v7 = vld [vmem:[#allocation4 + $0x14] ss:$8 sps:$4 sm:$0xff]   ;;  %291 = vmatpush1.bf16.msra.mxu1 %v630_v5  ;;  %v633_v8 = vld [vmem:[#allocation4 + $0x10] ss:$8 sps:$4 sm:$0xff]   ;;  %v624_v10 = vld [vmem:[#allocation2 + $0x20] sm:$0xff]  }
  0x3a   :  { %292 = vmatprep.subr.bf16.mxu1 %v631_v7  ;;  %v625_v12 = vld [vmem:[#allocation2 + $0x28] sm:$0xff]   ;;  %v637_v13 = vld [vmem:[#allocation4 + $0x34] ss:$8 sps:$4 sm:$0xff]   ;;  %v639_v14 = vld [vmem:[#allocation4 + $0x30] ss:$8 sps:$4 sm:$0xff]   ;;  %322 = vmatprep.mubr.bf16.mxu1 %v747_v26  ;;  %v202_v53 = vsub.s32 0, %v201_v52 }
  0x3b   :  { %v640_v15 = vld [vmem:[#allocation4 + $0x44] ss:$8 sps:$4 sm:$0xff]   ;;  %v626_v16 = vld [vmem:[#allocation2 + $0x30] sm:$0xff]   ;;  %v642_v17 = vld [vmem:[#allocation4 + $0x40] ss:$8 sps:$4 sm:$0xff]   ;;  %v206_v55 = vsub.s32 1, %v201_v52 }
  0x3c   :  { %593 = vmatpush3.bf16.msra.mxu0 %v621_v2  ;;  %v643_v18 = vld [vmem:[#allocation4 + $0x54] ss:$8 sps:$4 sm:$0xff]   ;;  %v645_v20 = vld [vmem:[#allocation4 + $0x50] ss:$8 sps:$4 sm:$0xff]   ;;  %v646_v21 = vld [vmem:[#allocation4 + $0x64] ss:$8 sps:$4 sm:$0xff]  }
  0x3d   :  { %594 = vmatprep.subr.bf16.mxu0 %v745_v0  ;;  %293 = vmatpush1.bf16.msra.mxu1 %v633_v8  ;;  %v627_v19 = vld [vmem:[#allocation2 + $0x38] sm:$0xff]   ;;  %v68_v22 = vld [vmem:[%s839_s0] sm:$0xf]  ;;  %v654_v29 = vld [vmem:[#allocation6 + $0x48] sm:$0xff]  }
  0x3e   :  { %294 = vmatprep.subr.bf16.mxu1 %v634_v9  ;;  %v648_v23 = vld [vmem:[#allocation4 + $0x60] ss:$8 sps:$4 sm:$0xff]   ;;  %v649_v24 = vld [vmem:[#allocation4 + $0x74] ss:$8 sps:$4 sm:$0xff]   ;;  %v651_v25 = vld [vmem:[#allocation4 + $0x70] ss:$8 sps:$4 sm:$0xff]  }
  0x3f   :  { %v652_v27 = vld [vmem:[#allocation6 + $0x40] sm:$0xff]   ;;  %v655_v30 = vld [vmem:[#allocation6 + $0x8] sm:$0xff]   ;;  %v656_v31 = vld [vmem:[#allocation6 + $0x50] sm:$0xff]  }
  0x40   :  { %595 = vmatpush3.bf16.msra.mxu0 %v622_v3  ;;  %v653_v28 = vld [vmem:[#allocation6] sm:$0xff]   ;;  %v657_v32 = vld [vmem:[#allocation6 + $0x10] sm:$0xff]   ;;  %v658_v33 = vld [vmem:[#allocation6 + $0x58] sm:$0xff]  }
  0x41   :  { %596 = vmatprep.subr.bf16.mxu0 %v745_v0  ;;  %295 = vmatpush1.bf16.msra.mxu1 %v636_v11  ;;  %v659_v34 = vld [vmem:[#allocation6 + $0x18] sm:$0xff]   ;;  %v660_v35 = vld [vmem:[#allocation6 + $0x60] sm:$0xff]   ;;  %v662_v37 = vld [vmem:[#allocation6 + $0x68] sm:$0xff]  }
  0x42   :  { %296 = vmatprep.subr.bf16.mxu1 %v637_v13  ;;  %v661_v36 = vld [vmem:[#allocation6 + $0x20] sm:$0xff]   ;;  %v663_v38 = vld [vmem:[#allocation6 + $0x28] sm:$0xff]   ;;  %v664_v47 = vld [vmem:[#allocation6 + $0x70] sm:$0xff]  }
  0x43   :  { %v517_v39 = vld [vmem:[%s841_s2] ss:$0 sm:$0xff]  ;;  %v665_v48 = vld [vmem:[#allocation6 + $0x30] sm:$0xff]   ;;  %v666_v49 = vld [vmem:[#allocation6 + $0x78] sm:$0xff]  }
  0x44   :  { %597 = vmatpush3.bf16.msra.mxu0 %v623_v6  ;;  %v667_v50 = vld [vmem:[#allocation6 + $0x38] sm:$0xff]   ;;  %v198_v54 = vld [vmem:[%s843_s4] sm:$0x3] }
  0x45   :  { %598 = vmatprep.subr.bf16.mxu0 %v745_v0  ;;  %297 = vmatpush1.bf16.msra.mxu1 %v639_v14  ;;  %v203_v56 = vrot.slane %v198_v54, %v202_v53  ;;  %v207_v57 = vrot.slane %v198_v54, %v206_v55  ;;  %v542_v5 = vld [vmem:[%s845_s6] ss:$0 sm:$0xff] }
  0x46   :  { %298 = vmatprep.subr.bf16.mxu1 %v640_v15 }
  0x48   :  { %599 = vmatpush3.bf16.msra.mxu0 %v624_v10 }
  0x49   :  { %600 = vmatprep.subr.bf16.mxu0 %v745_v0  ;;  %299 = vmatpush1.bf16.msra.mxu1 %v642_v17 }
  0x4a   :  { %300 = vmatprep.subr.bf16.mxu1 %v643_v18 }
  0x4c   :  { %601 = vmatpush3.bf16.msra.mxu0 %v625_v12 }
  0x4d   :  { %602 = vmatprep.subr.bf16.mxu0 %v745_v0  ;;  %301 = vmatpush1.bf16.msra.mxu1 %v645_v20 }
  0x4e   :  { %302 = vmatprep.subr.bf16.mxu1 %v646_v21 }
  0x50   :  { %603 = vmatpush3.bf16.msra.mxu0 %v626_v16 }
  0x51   :  { %604 = vmatprep.subr.bf16.mxu0 %v745_v0  ;;  %303 = vmatpush1.bf16.msra.mxu1 %v648_v23 }
  0x52   :  { %304 = vmatprep.subr.bf16.mxu1 %v649_v24 }
  0x54   :  { %605 = vmatpush3.bf16.msra.mxu0 %v627_v19 }
  0x55   :  { %305 = vmatpush1.bf16.msra.mxu1 %v651_v25  ;;  %568 = vmatprep.subr.bf16.mxu0 %v652_v27 }
  0x57   :  { %607 = vmatmul.mubr.bf16.vlgmr.msra.gmra.mrb[0].mxu0 %v68_v22 }
  0x58   :  { %569 = vmatpush3.bf16.msra.mxu0 %v653_v28 }
  0x59   :  { %570 = vmatprep.subr.bf16.mxu0 %v654_v29 }
  0x5c   :  { %571 = vmatpush3.bf16.msra.mxu0 %v655_v30 }
  0x5d   :  { %572 = vmatprep.subr.bf16.mxu0 %v656_v31 }
  0x60   :  { %573 = vmatpush3.bf16.msra.mxu0 %v657_v32 }
  0x61   :  { %574 = vmatprep.subr.bf16.mxu0 %v658_v33 }
  0x64   :  { %575 = vmatpush3.bf16.msra.mxu0 %v659_v34 }
  0x65   :  { %576 = vmatprep.subr.bf16.mxu0 %v660_v35 }
  0x68   :  { %577 = vmatpush3.bf16.msra.mxu0 %v661_v36 }
  0x69   :  { %578 = vmatprep.subr.bf16.mxu0 %v662_v37 }
  0x6c   :  { %579 = vmatpush3.bf16.msra.mxu0 %v663_v38 }
  0x6d   :  { %580 = vmatprep.subr.bf16.mxu0 %v664_v47 }
  0x70   :  { %581 = vmatpush3.bf16.msra.mxu0 %v665_v48 }
  0x71   :  { %582 = vmatprep.subr.bf16.mxu0 %v666_v49 }
  0x74   :  { %583 = vmatpush3.bf16.msra.mxu0 %v667_v50 }
 0x12a   :  { %v174_v40 = vpop.f32.mrb[0].mxu0 }
 0x12b   :  { %v175_v41 = vadd.f32 %v517_v39, %v174_v40  ;;  %v608_v42 = vpop.f32.mrb[1].mxu0 }
 0x12c   :  { %v177_v43 = vpop.f32.mrb[2].mxu0 }
 0x12d   :  { %v180_v44 = vmax.f32 %v175_v41, 0.0  ;;  %v609_v45 = vpop.f32.mrb[3].mxu0 }
 0x12f   :  { %v181_v46 = vpack.c.bf16 %v180_v44, %v180_v44 }
 0x131   :  { %323 = vmatmul.mubr.bf16.vlgmr.msra.gmra.mrb[0].mxu1 %v181_v46 }
 0x204   :  { %v324_v58 = vpop.f32.mrb[0].mxu1 }
 0x205   :  { %v325_v59 = vadd.f32 %v324_v58, %v203_v56  ;;  %v326_v60 = vpop.f32.mrb[1].mxu1 }
 0x206   :  { %v327_v61 = vadd.f32 %v326_v60, %v207_v57  ;;  %v328_v62 = vpop.f32.mrb[2].mxu1 }
 0x207   :  { %v331_v63 = vmax.f32 %v325_v59, 0.0  ;;  %v329_v0 = vpop.f32.mrb[3].mxu1 }
 0x208   :  { %v332_v1 = vmax.f32 %v327_v61, 0.0 }
 0x209   :  { %v333_v3 = vpack.c.bf16 %v331_v63, %v331_v63 }
 0x20a   :  { %v334_v2 = vpack.c.bf16 %v332_v1, %v332_v1 }
 0x20c   :  { %502 = vmatprep.mubr.bf16.mxu0 %v334_v2 }
 0x20d   :  { %503 = vmatmul.mubr.bf16.vlgmr.msra.gmra.mrb[4].mxu0 %v333_v3 }
 0x2e0   :  { %v584_v4 = vpop.f32.mrb[4].mxu0 }
 0x2e1   :  { %v585_v6 = vpop.f32.mrb[5].mxu0 }
 0x2e2   :  { %v586_v7 = vadd.f32 %v585_v6, %v584_v4  ;;  %v587_v8 = vpop.f32.mrb[6].mxu0 }
 0x2e3   :  { %v588_v9 = vpop.f32.mrb[7].mxu0 }
 0x2e4   :  { %v505_v10 = vadd.f32 %v586_v7, %v542_v5 }
 0x2e6   :  { %510 = vst [vmem:[%s846_s7] sm:$0xff] %v505_v10 }
 0x2e7   :  { %515 = vsyncpa [#allocation3], 1 }
 0x2e8   :  { %516 = vsyncpa [#allocation5], 1 }

</bundles_post_ra>
